<compile_context>
chip_gen: v5e
topology: v5e:2x2
jax: 0.10.0
libtpu: 0.0.40
codegen_flags: <defaults>
</compile_context>

<pallas_src>
import jax
import jax.numpy as jnp
from jax.experimental import pallas as pl
from jax.experimental.pallas import tpu as pltpu

LANE = 128      # vreg lane width (last dim)
SUBLANE = 8     # f32 sublane count (second-to-last dim)


def _round_up(x: int, m: int) -> int:
    return ((x + m - 1) // m) * m


def _feature_multiple() -> int:
    """Pad large feature dims to 256 on v6e/v7x (2x256x256 MXU), 128 on v5e and older."""
    try:
        kind = jax.devices()[0].device_kind.lower()
    except Exception:
        return LANE
    for old in ("v2", "v3", "v4", "v5"):
        if old in kind:
            return LANE
    return 2 * LANE


def _pad_dim(d: int, feature_multiple: int) -> int:
    # Small dims only need lane alignment; dims already > 128 get the MXU-width pad.
    return _round_up(d, feature_multiple if d > LANE else LANE)


# --------------------------------------------------------------------------- #
# Fused kernel: the entire MLP in one body.
# --------------------------------------------------------------------------- #
def _fused_mlp_kernel(x_ref, *refs):
    """refs = (w0, b0, w1, b1, ..., wL-1, bL-1, o_ref); all padded to lane width."""
    o_ref = refs[-1]
    wb_refs = refs[:-1]
    n_layers = len(wb_refs) // 2

    h = x_ref[...].astype(jnp.float32)              # [BT, IN_P]
    for i in range(n_layers):
        w = wb_refs[2 * i][...]                     # [D_IN_P, D_OUT_P], bf16
        b = wb_refs[2 * i + 1][...]                 # [1, D_OUT_P], f32
        # bf16 x bf16 -> f32 accumulate on the MXU; bias-add / ReLU stay f32 (VPU).
        h = jnp.dot(h.astype(jnp.bfloat16), w,
                    preferred_element_type=jnp.float32) + b
        if i != n_layers - 1:
            h = jnp.maximum(h, 0.0)
    o_ref[...] = h.astype(o_ref.dtype)


# --------------------------------------------------------------------------- #
# Parameter init / padding.
# --------------------------------------------------------------------------- #
def init_mlp_params(key, obs_dim, act_dim, hidden_dim, n_hidden, dtype=jnp.float32):
    """Matches nn.Linear default init U(-1/sqrt(fan_in), 1/sqrt(fan_in)).

    Layer structure matches the PyTorch module:
      Linear(obs_dim, hidden) + ReLU
      (n_hidden - 2) x [Linear(hidden, hidden) + ReLU]
      Linear(hidden, act_dim)
    """
    dims = [obs_dim] + [hidden_dim] * (n_hidden - 1) + [act_dim]
    params = []
    for d_in, d_out in zip(dims[:-1], dims[1:]):
        kw, kb, key = jax.random.split(key, 3)
        bound = 1.0 / (d_in ** 0.5)
        # stored as [in, out] (PyTorch stores [out, in]); math is identical.
        w = jax.random.uniform(kw, (d_in, d_out), dtype, minval=-bound, maxval=bound)
        b = jax.random.uniform(kb, (1, d_out), dtype, minval=-bound, maxval=bound)
        params.append((w, b))
    return params


def pad_params_to_lanes(params, feature_multiple=None):
    """Zero-pad feature dims to lane/MXU multiples; store weights bf16, biases f32.

    Zero rows/cols in W and zero bias lanes keep the real outputs exact and the
    padded lanes at 0 (ReLU(0) = 0), so padding propagates harmlessly.
    Do this ONCE; reuse the padded params for every forward call.
    """
    if feature_multiple is None:
        feature_multiple = _feature_multiple()
    padded = []
    for w, b in params:
        d_in, d_out = w.shape
        p_in, p_out = _pad_dim(d_in, feature_multiple), _pad_dim(d_out, feature_multiple)
        wp = jnp.zeros((p_in, p_out), jnp.bfloat16).at[:d_in, :d_out].set(
            w.astype(jnp.bfloat16))
        bp = jnp.zeros((1, p_out), jnp.float32).at[:, :d_out].set(b.astype(jnp.float32))
        padded.append((wp, bp))
    return padded


# --------------------------------------------------------------------------- #
# Forward pass: one pallas_call for the whole network.
# --------------------------------------------------------------------------- #
def mlp_forward(padded_params, x, act_dim, *, batch_tile=512):
    """x: [B, obs_dim] unpadded f32 input. Returns [B, act_dim]."""
    B, obs_dim = x.shape
    in_p = padded_params[0][0].shape[0]
    out_p = padded_params[-1][0].shape[1]
    assert obs_dim <= in_p and act_dim <= out_p

    # ---- batch tiling: tile is the MXU M dim, never below 128 for big batches.
    b_pad = _round_up(max(B, SUBLANE), SUBLANE)
    bt = _round_up(max(batch_tile, 128), SUBLANE)
    bt = min(bt, b_pad)
    # v7x megacore: ensure >= 2 grid steps (each still >= 128 rows) when possible.
    if b_pad >= 2 * 128 and bt >= b_pad:
        bt = _round_up(-(-b_pad // 2), SUBLANE)
    b_pad = _round_up(b_pad, bt)
    grid = (b_pad // bt,)

    x_p = jnp.zeros((b_pad, in_p), x.dtype).at[:B, :obs_dim].set(x)

    # ---- specs: weights/bias grid-invariant -> single-buffered & resident.
    flat_wb = []
    wb_specs = []
    for wp, bp in padded_params:
        flat_wb += [wp, bp]
        wb_specs += [
            pl.BlockSpec(wp.shape, lambda i: (0, 0), pipeline_mode=pl.Buffered(1)),
            pl.BlockSpec(bp.shape, lambda i: (0, 0), pipeline_mode=pl.Buffered(1)),
        ]

    # ---- VMEM budget / residency guard.
    wb_bytes = sum(wp.size * wp.dtype.itemsize + bp.size * bp.dtype.itemsize
                   for wp, bp in padded_params)                       # 1 buffer each
    if wb_bytes > (40 << 20):
        # TODO(synk): stream weight tiles over an extra grid axis with a VMEM f32
        # accumulator (pl.when init/finalize) instead of keeping all layers resident.
        raise NotImplementedError(
            "resident bf16 weights exceed ~40 MiB; weight-streaming path needed for v7x")
    max_feat = max(in_p, out_p, max(wp.shape[1] for wp, _ in padded_params))
    io_bytes = 2 * bt * in_p * 4 + 2 * bt * out_p * 4                 # double-buffered x/out
    act_bytes = 2 * bt * max_feat * 4 + bt * max_feat * 2             # f32 h + bf16 cast copy
    vmem_bytes = int((wb_bytes + io_bytes + act_bytes) * 5 // 4) + (2 << 20)
    vmem_bytes = min(max(vmem_bytes, 16 << 20), 64 << 20)

    # ---- cost hint for XLA's scheduler.
    flops = 2 * b_pad * sum(wp.shape[0] * wp.shape[1] for wp, _ in padded_params)
    bytes_accessed = (wb_bytes
                      + x_p.size * x_p.dtype.itemsize
                      + b_pad * out_p * x.dtype.itemsize)
    cost = pl.CostEstimate(flops=flops, transcendentals=0, bytes_accessed=bytes_accessed)

    out_padded = pl.pallas_call(
        _fused_mlp_kernel,
        out_shape=jax.ShapeDtypeStruct((b_pad, out_p), x.dtype),
        grid=grid,
        in_specs=[pl.BlockSpec((bt, in_p), lambda i: (i, 0))] + wb_specs,
        out_specs=pl.BlockSpec((bt, out_p), lambda i: (i, 0)),
        compiler_params=pltpu.CompilerParams(
            # batch tiles are independent -> shard across v7x's 2 TCs (no-op on v5e/v6e)
            dimension_semantics=("parallel",),
            vmem_limit_bytes=vmem_bytes,
        ),
        cost_estimate=cost,
    )(x_p, *flat_wb)

    return out_padded[:B, :act_dim]


# --------------------------------------------------------------------------- #
# Pure-JAX references.
# --------------------------------------------------------------------------- #
def mlp_forward_ref(params, x):
    """f32 reference on the ORIGINAL, unpadded params."""
    n_layers = len(params)
    h = x
    for i, (w, b) in enumerate(params):
        h = h @ w + b
        if i != n_layers - 1:
            h = jnp.maximum(h, 0.0)
    return h


def mlp_forward_ref_bf16(padded_params, x, obs_dim, act_dim):
    """Precision-matched reference: same bf16-in / f32-accumulate math as the kernel."""
    in_p = padded_params[0][0].shape[0]
    h = jnp.zeros((x.shape[0], in_p), jnp.float32).at[:, :obs_dim].set(x)
    n_layers = len(padded_params)
    for i, (w, b) in enumerate(padded_params):
        h = jnp.dot(h.astype(jnp.bfloat16), w, preferred_element_type=jnp.float32) + b
        if i != n_layers - 1:
            h = jnp.maximum(h, 0.0)
    return h[:, :act_dim]


if __name__ == "__main__":
    # Small shapes consistent with the module's forward: x is [batch, obs_dim].
    obs_dim, act_dim, hidden_dim, n_hidden = 16, 4, 32, 3
    batch = 8

    key = jax.random.PRNGKey(0)
    kx, kp = jax.random.split(key)
    x = jax.random.normal(kx, (batch, obs_dim), jnp.float32)
    params = init_mlp_params(kp, obs_dim, act_dim, hidden_dim, n_hidden)
    padded_params = pad_params_to_lanes(params)   # once, outside the hot path

    # Single-block path (tiny batch).
    out = jax.block_until_ready(mlp_forward(padded_params, x, act_dim))
    ref_f32 = jax.block_until_ready(mlp_forward_ref(params, x))
    ref_bf16 = jax.block_until_ready(mlp_forward_ref_bf16(padded_params, x, obs_dim, act_dim))
    assert out.shape == (batch, act_dim), out.shape
    assert jnp.allclose(out, ref_bf16, atol=1e-3, rtol=1e-3), "mismatch vs bf16-matched ref"
    assert jnp.allclose(out, ref_f32, atol=5e-2, rtol=5e-2), "mismatch vs f32 ref"

    # Exercise the batch grid (2 parallel tiles >= 128 rows) with a non-aligned batch.
    batch2 = 300
    x2 = jax.random.normal(jax.random.PRNGKey(1), (batch2, obs_dim), jnp.float32)
    out2 = jax.block_until_ready(mlp_forward(padded_params, x2, act_dim))
    ref2_f32 = jax.block_until_ready(mlp_forward_ref(params, x2))
    ref2_bf16 = jax.block_until_ready(mlp_forward_ref_bf16(padded_params, x2, obs_dim, act_dim))
    assert out2.shape == (batch2, act_dim), out2.shape
    assert jnp.allclose(out2, ref2_bf16, atol=1e-3, rtol=1e-3), "mismatch vs bf16-matched ref (grid)"
    assert jnp.allclose(out2, ref2_f32, atol=5e-2, rtol=5e-2), "mismatch vs f32 ref (grid)"

    print("KERNEL_OK")
</pallas_src>

<mosaic_0001>
module attributes {stable_mosaic.version = 11 : i64} {
  func.func @_fused_mlp_kernel(%arg0: i32, %arg1: memref<8x128xf32, #tpu.memory_space<vmem>>, %arg2: memref<128x128xbf16, #tpu.memory_space<vmem>>, %arg3: memref<1x128xf32, #tpu.memory_space<vmem>>, %arg4: memref<128x128xbf16, #tpu.memory_space<vmem>>, %arg5: memref<1x128xf32, #tpu.memory_space<vmem>>, %arg6: memref<128x128xbf16, #tpu.memory_space<vmem>>, %arg7: memref<1x128xf32, #tpu.memory_space<vmem>>, %arg8: memref<8x128xf32, #tpu.memory_space<vmem>>) attributes {dimension_semantics = [#tpu.dimension_semantics<parallel>], iteration_bounds = array<i64: 1>, scalar_prefetch = 0 : i64, scratch_operands = 0 : i64, tpu.core_type = #tpu.core_type<tc>, window_params = [{transform_indices = @transform_0, window_bounds = array<i64: 8, 128>}, {pipeline_mode = #tpu.pipeline_mode<synchronous>, transform_indices = @transform_1, window_bounds = array<i64: 128, 128>}, {pipeline_mode = #tpu.pipeline_mode<synchronous>, transform_indices = @transform_2, window_bounds = array<i64: 1, 128>}, {pipeline_mode = #tpu.pipeline_mode<synchronous>, transform_indices = @transform_3, window_bounds = array<i64: 128, 128>}, {pipeline_mode = #tpu.pipeline_mode<synchronous>, transform_indices = @transform_4, window_bounds = array<i64: 1, 128>}, {pipeline_mode = #tpu.pipeline_mode<synchronous>, transform_indices = @transform_5, window_bounds = array<i64: 128, 128>}, {pipeline_mode = #tpu.pipeline_mode<synchronous>, transform_indices = @transform_6, window_bounds = array<i64: 1, 128>}, {transform_indices = @transform_7, window_bounds = array<i64: 8, 128>}]} {
    %c0 = arith.constant 0 : index
    %c0_0 = arith.constant 0 : index
    %0 = vector.load %arg1[%c0, %c0_0] : memref<8x128xf32, #tpu.memory_space<vmem>>, vector<8x128xf32>
    %c0_1 = arith.constant 0 : index
    %c0_2 = arith.constant 0 : index
    %1 = vector.load %arg2[%c0_1, %c0_2] : memref<128x128xbf16, #tpu.memory_space<vmem>>, vector<128x128xbf16>
    %c0_3 = arith.constant 0 : index
    %c0_4 = arith.constant 0 : index
    %2 = vector.load %arg3[%c0_3, %c0_4] : memref<1x128xf32, #tpu.memory_space<vmem>>, vector<1x128xf32>
    %3 = arith.truncf %0 : vector<8x128xf32> to vector<8x128xbf16>
    %cst = arith.constant dense<0.000000e+00> : vector<8x128xf32>
    %4 = tpu.matmul %3, %1, %cst {dimension_numbers = #tpu.dot_dimension_numbers<[1], [0], [0], [1], [0, 0, 1, 1], [], []>} : vector<8x128xbf16>, vector<128x128xbf16>, vector<8x128xf32> -> vector<8x128xf32>
    %5 = vector.broadcast %2 : vector<1x128xf32> to vector<8x128xf32>
    %6 = arith.addf %4, %5 : vector<8x128xf32>
    %cst_5 = arith.constant 0.000000e+00 : f32
    %7 = vector.broadcast %cst_5 : f32 to vector<8x128xf32>
    %8 = arith.maximumf %6, %7 : vector<8x128xf32>
    %c0_6 = arith.constant 0 : index
    %c0_7 = arith.constant 0 : index
    %9 = vector.load %arg4[%c0_6, %c0_7] : memref<128x128xbf16, #tpu.memory_space<vmem>>, vector<128x128xbf16>
    %c0_8 = arith.constant 0 : index
    %c0_9 = arith.constant 0 : index
    %10 = vector.load %arg5[%c0_8, %c0_9] : memref<1x128xf32, #tpu.memory_space<vmem>>, vector<1x128xf32>
    %11 = arith.truncf %8 : vector<8x128xf32> to vector<8x128xbf16>
    %cst_10 = arith.constant dense<0.000000e+00> : vector<8x128xf32>
    %12 = tpu.matmul %11, %9, %cst_10 {dimension_numbers = #tpu.dot_dimension_numbers<[1], [0], [0], [1], [0, 0, 1, 1], [], []>} : vector<8x128xbf16>, vector<128x128xbf16>, vector<8x128xf32> -> vector<8x128xf32>
    %13 = vector.broadcast %10 : vector<1x128xf32> to vector<8x128xf32>
    %14 = arith.addf %12, %13 : vector<8x128xf32>
    %cst_11 = arith.constant 0.000000e+00 : f32
    %15 = vector.broadcast %cst_11 : f32 to vector<8x128xf32>
    %16 = arith.maximumf %14, %15 : vector<8x128xf32>
    %c0_12 = arith.constant 0 : index
    %c0_13 = arith.constant 0 : index
    %17 = vector.load %arg6[%c0_12, %c0_13] : memref<128x128xbf16, #tpu.memory_space<vmem>>, vector<128x128xbf16>
    %c0_14 = arith.constant 0 : index
    %c0_15 = arith.constant 0 : index
    %18 = vector.load %arg7[%c0_14, %c0_15] : memref<1x128xf32, #tpu.memory_space<vmem>>, vector<1x128xf32>
    %19 = arith.truncf %16 : vector<8x128xf32> to vector<8x128xbf16>
    %cst_16 = arith.constant dense<0.000000e+00> : vector<8x128xf32>
    %20 = tpu.matmul %19, %17, %cst_16 {dimension_numbers = #tpu.dot_dimension_numbers<[1], [0], [0], [1], [0, 0, 1, 1], [], []>} : vector<8x128xbf16>, vector<128x128xbf16>, vector<8x128xf32> -> vector<8x128xf32>
    %21 = vector.broadcast %18 : vector<1x128xf32> to vector<8x128xf32>
    %22 = arith.addf %20, %21 : vector<8x128xf32>
    %c0_17 = arith.constant 0 : index
    %c0_18 = arith.constant 0 : index
    %23 = vector.load %arg8[%c0_17, %c0_18] : memref<8x128xf32, #tpu.memory_space<vmem>>, vector<8x128xf32>
    tpu.vector_store %arg8[%c0_17, %c0_18], %22 {strides = array<i32>} : memref<8x128xf32, #tpu.memory_space<vmem>>, vector<8x128xf32>,
    return
  }
  func.func @transform_0(%arg0: i32) -> (i32, i32) {
    %c0_i32 = arith.constant 0 : i32
    %c0_i32_0 = arith.constant 0 : i32
    return %arg0, %c0_i32 : i32, i32
  }
  func.func @transform_1(%arg0: i32) -> (i32, i32) {
    %c0_i32 = arith.constant 0 : i32
    %c0_i32_0 = arith.constant 0 : i32
    %c0_i32_1 = arith.constant 0 : i32
    return %c0_i32, %c0_i32_0 : i32, i32
  }
  func.func @transform_2(%arg0: i32) -> (i32, i32) {
    %c0_i32 = arith.constant 0 : i32
    %c0_i32_0 = arith.constant 0 : i32
    %c0_i32_1 = arith.constant 0 : i32
    return %c0_i32, %c0_i32_0 : i32, i32
  }
  func.func @transform_3(%arg0: i32) -> (i32, i32) {
    %c0_i32 = arith.constant 0 : i32
    %c0_i32_0 = arith.constant 0 : i32
    %c0_i32_1 = arith.constant 0 : i32
    return %c0_i32, %c0_i32_0 : i32, i32
  }
  func.func @transform_4(%arg0: i32) -> (i32, i32) {
    %c0_i32 = arith.constant 0 : i32
    %c0_i32_0 = arith.constant 0 : i32
    %c0_i32_1 = arith.constant 0 : i32
    return %c0_i32, %c0_i32_0 : i32, i32
  }
  func.func @transform_5(%arg0: i32) -> (i32, i32) {
    %c0_i32 = arith.constant 0 : i32
    %c0_i32_0 = arith.constant 0 : i32
    %c0_i32_1 = arith.constant 0 : i32
    return %c0_i32, %c0_i32_0 : i32, i32
  }
  func.func @transform_6(%arg0: i32) -> (i32, i32) {
    %c0_i32 = arith.constant 0 : i32
    %c0_i32_0 = arith.constant 0 : i32
    %c0_i32_1 = arith.constant 0 : i32
    return %c0_i32, %c0_i32_0 : i32, i32
  }
  func.func @transform_7(%arg0: i32) -> (i32, i32) {
    %c0_i32 = arith.constant 0 : i32
    %c0_i32_0 = arith.constant 0 : i32
    return %arg0, %c0_i32 : i32, i32
  }
}

</mosaic_0001>

<bundles_post_ra>
// kernel: tpu_custom_call.1
= control target key start
LH: loop header
LB: loop body
LE: loop exit
PB: predicated region body
PF: predicated region fallthrough
CT: control target
= control target key end

     0   :  { %12 = vsyncpa [#allocation3], 0  ;;  %s686_s0 = inlined_call_operand.hbm [shape: f32[8,128], index: 0, kind: input, shape index: {}]   ;;  %s687_s1 = inlined_call_operand.hbm [shape: bf16[128,128], index: 1, kind: input, shape index: {}]   ;;  %s688_s2 = inlined_call_operand.vmem [shape: f32[1,128], index: 2, kind: input, shape index: {}]   ;;  %s689_s3 = inlined_call_operand.hbm [shape: bf16[128,128], index: 3, kind: input, shape index: {}]   ;;  %s690_s4 = inlined_call_operand.vmem [shape: f32[1,128], index: 4, kind: input, shape index: {}]   ;;  %s691_s5 = inlined_call_operand.hbm [shape: bf16[128,128], index: 5, kind: input, shape index: {}]   ;;  %s692_s6 = inlined_call_operand.vmem [shape: f32[1,128], index: 6, kind: input, shape index: {}]   ;;  %s693_s7 = inlined_call_operand.hbm [shape: f32[8,128], index: 7, kind: output, shape index: {}]  }
   0x1   :  { %13 = vsyncpa [#allocation6], 0 }
   0x2   :  { %14 = vsyncpa [#allocation9], 0  ;;  %s31_s26 = sshll.u32 %s687_s1, 4  ;;  %s32_s26 = int_to_ptr.hbm [resolvable:$true] %s31_s26 }
   0x3   :  { %15 = vsyncpa [#allocation4], 0  ;;  %s615_s27 = smov [#allocation5]   ;;  %s21_s8 = sshll.u32 %s686_s0, 4  ;;  %s22_s8 = int_to_ptr.hbm [resolvable:$true] %s21_s8 }
   0x4   :  { %s33_s28 = sshll.u32 %s615_s27, 4  ;;  %s616_s9 = smov 64   ;;  %s34_s28 = int_to_ptr.vmem [resolvable:$true] %s33_s28 }
   0x5   :  { %s617_s10 = smov 4   ;;  %s618_s11 = smov [#allocation2]  }
   0x6   :  { %39 = dma.hbm_to_vmem [thread:$0]  %s32_s26, 1024, %s34_s28, [#allocation6], %s616_s9, %s616_s9, %s617_s10  }
   0x7   :  { %s23_s12 = sshll.u32 %s618_s11, 4  ;;  %s46_s15 = sshll.u32 %s689_s3, 4  ;;  %s24_s12 = int_to_ptr.vmem [resolvable:$true] %s23_s12  ;;  %s47_s15 = int_to_ptr.hbm [resolvable:$true] %s46_s15 }
   0x8   :  { %26 = dma.hbm_to_vmem [thread:$0]  %s22_s8, 128, %s24_s12, [#allocation3]  }
   0x9   :  { %s61_s17 = sshll.u32 %s691_s5, 4  ;;  %s619_s18 = smov [#allocation7]   ;;  %s62_s17 = int_to_ptr.hbm [resolvable:$true] %s61_s17 }
   0xa   :  { %s48_s19 = sshll.u32 %s619_s18, 4  ;;  %s620_s0 = smov [#allocation8]   ;;  %s49_s19 = int_to_ptr.vmem [resolvable:$true] %s48_s19 }
   0xb   :  { %54 = dma.hbm_to_vmem [thread:$0]  %s47_s15, 1024, %s49_s19, [#allocation6], %s616_s9, %s616_s9, %s617_s10  }
   0xc   :  { %s63_s20 = sshll.u32 %s620_s0, 4  ;;  %s64_s20 = int_to_ptr.vmem [resolvable:$true] %s63_s20 }
   0xd   :  { %69 = dma.hbm_to_vmem [thread:$0]  %s62_s17, 1024, %s64_s20, [#allocation9], %s616_s9, %s616_s9, %s617_s10  }
   0xe   :  { %607 = dma.done.wait [#allocation3], 128  }
   0xf   :  { %608 = vsyncadd [#allocation3], 4294967168 }
  0x10   :  { %609 = dma.done.wait [#allocation6], 2048  }
  0x11   :  { %610 = vsyncadd [#allocation6], 4294965248 }
  0x12   :  { %611 = dma.done.wait [#allocation9], 1024  }
  0x13   :  { %612 = vsyncadd [#allocation9], 4294966272  ;;  %v460_v0 = vld [vmem:[#allocation5 + $0x38] sm:$0xff]  ;;  %v459_v1 = vld [vmem:[#allocation5 + $0x30] sm:$0xff]  ;;  %s621_s24 = smov [#allocation10]   ;;  %s345_s28 = sshll.u32 %s693_s7, 4  ;;  %s346_s28 = int_to_ptr.hbm [resolvable:$true] %s345_s28 }
  0x14   :  { %158 = vmatpush.bf16.msra.mxu0 %v460_v0  ;;  %v468_v2 = vld [vmem:[#allocation7 + $0x38] sm:$0xff]  ;;  %v467_v3 = vld [vmem:[#allocation7 + $0x30] sm:$0xff]  ;;  %v458_v4 = vld [vmem:[#allocation5 + $0x28] sm:$0xff]  ;;  %s343_s25 = sshll.u32 %s621_s24, 4  ;;  %s344_s25 = int_to_ptr.vmem [resolvable:$true] %s343_s25 }
  0x15   :  { %241 = vmatpush.bf16.msra.mxu1 %v468_v2  ;;  %v466_v5 = vld [vmem:[#allocation7 + $0x28] sm:$0xff]  ;;  %v457_v6 = vld [vmem:[#allocation5 + $0x20] sm:$0xff]  ;;  %v456_v8 = vld [vmem:[#allocation5 + $0x18] sm:$0xff] }
  0x16   :  { %v465_v7 = vld [vmem:[#allocation7 + $0x20] sm:$0xff]  ;;  %v464_v9 = vld [vmem:[#allocation7 + $0x18] sm:$0xff]  ;;  %v455_v10 = vld [vmem:[#allocation5 + $0x10] sm:$0xff] }
  0x17   :  { %v463_v11 = vld [vmem:[#allocation7 + $0x10] sm:$0xff]  ;;  %v454_v12 = vld [vmem:[#allocation5 + $0x8] sm:$0xff]  ;;  %v453_v13 = vld [vmem:[#allocation5] sm:$0xff] }
  0x18   :  { %159 = vmatpush.bf16.msra.mxu0 %v459_v1  ;;  %v88_v14 = vld [vmem:[#allocation2] sm:$0xff]  ;;  %v462_v16 = vld [vmem:[#allocation7 + $0x8] sm:$0xff]  ;;  %v461_v17 = vld [vmem:[#allocation7] sm:$0xff] }
  0x19   :  { %242 = vmatpush.bf16.msra.mxu1 %v467_v3  ;;  %v106_v15 = vpack.c.bf16 %v88_v14, %v88_v14  ;;  %v476_v18 = vld [vmem:[#allocation8 + $0x38] sm:$0xff]  ;;  %v475_v19 = vld [vmem:[#allocation8 + $0x30] sm:$0xff]  ;;  %v474_v20 = vld [vmem:[#allocation8 + $0x28] sm:$0xff] }
  0x1a   :  { %324 = vmatpush.bf16.msra.mxu2 %v476_v18  ;;  %v473_v21 = vld [vmem:[#allocation8 + $0x20] sm:$0xff]  ;;  %v472_v22 = vld [vmem:[#allocation8 + $0x18] sm:$0xff]  ;;  %v471_v23 = vld [vmem:[#allocation8 + $0x10] sm:$0xff] }
  0x1b   :  { %v484_v24 = vld [vmem:[%s688_s2] ss:$0 sm:$0xff]  ;;  %v470_v30 = vld [vmem:[#allocation8 + $0x8] sm:$0xff]  ;;  %v469_v31 = vld [vmem:[#allocation8] sm:$0xff] }
  0x1c   :  { %160 = vmatpush.bf16.msra.mxu0 %v458_v4  ;;  %v485_v32 = vld [vmem:[%s690_s4] ss:$0 sm:$0xff] }
  0x1d   :  { %243 = vmatpush.bf16.msra.mxu1 %v466_v5  ;;  %v486_v38 = vld [vmem:[%s692_s6] ss:$0 sm:$0xff] }
  0x1e   :  { %325 = vmatpush.bf16.msra.mxu2 %v475_v19 }
  0x20   :  { %161 = vmatpush.bf16.msra.mxu0 %v457_v6 }
  0x21   :  { %244 = vmatpush.bf16.msra.mxu1 %v465_v7 }
  0x22   :  { %326 = vmatpush.bf16.msra.mxu2 %v474_v20 }
  0x24   :  { %162 = vmatpush.bf16.msra.mxu0 %v456_v8 }
  0x25   :  { %245 = vmatpush.bf16.msra.mxu1 %v464_v9 }
  0x26   :  { %327 = vmatpush.bf16.msra.mxu2 %v473_v21 }
  0x28   :  { %163 = vmatpush.bf16.msra.mxu0 %v455_v10 }
  0x29   :  { %246 = vmatpush.bf16.msra.mxu1 %v463_v11 }
  0x2a   :  { %328 = vmatpush.bf16.msra.mxu2 %v472_v22 }
  0x2c   :  { %164 = vmatpush.bf16.msra.mxu0 %v454_v12 }
  0x2d   :  { %247 = vmatpush.bf16.msra.mxu1 %v462_v16 }
  0x2e   :  { %329 = vmatpush.bf16.msra.mxu2 %v471_v23 }
  0x30   :  { %165 = vmatpush.bf16.msra.mxu0 %v453_v13 }
  0x31   :  { %248 = vmatpush.bf16.msra.mxu1 %v461_v17 }
  0x32   :  { %330 = vmatpush.bf16.msra.mxu2 %v470_v30 }
  0x33   :  { %166 = vmatmul.bf16.vlgmr.msra.gmra.mxu0 %v106_v15 }
  0x36   :  { %331 = vmatpush.bf16.msra.mxu2 %v469_v31 }
  0xb0   :  { %v167_v25 = vpop.f32.mrf.mxu0 }
  0xb1   :  { %v168_v26 = vadd.f32 %v484_v24, %v167_v25 }
  0xb3   :  { %v171_v27 = vmax.f32 %v168_v26, 0.0 }
  0xb5   :  { %v189_v28 = vpack.c.bf16 %v171_v27, %v171_v27 }
  0xb7   :  { %249 = vmatmul.bf16.vlgmr.msra.gmra.mxu1 %v189_v28 }
  0xb8   :  { %v169_v29 = vpop.f32.mrf.mxu0 }
 0x134   :  { %v250_v33 = vpop.f32.mrf.mxu1 }
 0x135   :  { %v251_v34 = vadd.f32 %v485_v32, %v250_v33 }
 0x137   :  { %v254_v35 = vmax.f32 %v251_v34, 0.0 }
 0x139   :  { %v272_v36 = vpack.c.bf16 %v254_v35, %v254_v35 }
 0x13b   :  { %332 = vmatmul.bf16.vlgmr.msra.gmra.mxu2 %v272_v36 }
 0x13c   :  { %v252_v37 = vpop.f32.mrf.mxu1 }
 0x1be   :  { %v333_v39 = vpop.f32.mrf.mxu2 }
 0x1bf   :  { %v334_v40 = vadd.f32 %v486_v38, %v333_v39 }
 0x1c1   :  { %337 = vst [vmem:[#allocation10] sm:$0xff] %v334_v40 }
 0x1c2   :  { %348 = dma.vmem_to_hbm [thread:$0]  %s344_s25, 128, %s346_s28, [#allocation4]  }
 0x1c6   :  { %v335_v41 = vpop.f32.mrf.mxu2 }
 0x1c7   :  { %613 = dma.done.wait [#allocation4], 128  }
 0x1c8   :  { %614 = vsyncadd [#allocation4], 4294967168 }
 0x1c9   :  { %353 = vsyncpa [#allocation3], 1 }
 0x1ca   :  { %354 = vsyncpa [#allocation6], 1 }
 0x1cb   :  { %355 = vsyncpa [#allocation9], 1 }
 0x1cc   :  { %356 = vsyncpa [#allocation4], 1 }

</bundles_post_ra>
